<compile_context>
chip_gen: v7x
topology: tpu7x:2x2x1
jax: 0.10.0
libtpu: 0.0.40
codegen_flags: <defaults>
</compile_context>

<pallas_src>
import functools
import math

import jax
import jax.numpy as jnp
from jax.experimental import pallas as pl
from jax.experimental.pallas import tpu as pltpu


_TARGET_BLOCK_BYTES = 2 << 20      # ~2 MiB input block (review: 2-4 MiB on v7x)
_MAX_TILE_ROWS = 4096
_MIN_BLOCKS = 4                    # keep >= 2 blocks per v7x TensorCore when possible
_MAX_PACKED_WIDTH = 512            # preferred packed lane width (v6e/v7x MXU rows)
_MAX_TOTAL_WIDTH = 2048            # hard cap on packed width (selector / block VMEM)


def _round_up(v: int, m: int) -> int:
    return ((v + m - 1) // m) * m


def _squash_kernel(x_ref, o_ref, *, caps_dim: int, num_segments: int, eps: float):
    """x_ref / o_ref: (tile_rows, num_segments * caps_dim) VMEM blocks.

    Each caps_dim-wide lane segment is an independent capsule vector.
    """
    x = x_ref[...].astype(jnp.float32)                            # (T, W)

    if num_segments == 1:
        # Single capsule per row: plain row reduction, one full-width store.
        sn = jnp.sum(x * x, axis=-1, keepdims=True)               # (T, 1)
        factor = sn / ((1.0 + sn) * (jnp.sqrt(sn) + eps))         # (T, 1)
        o_ref[...] = (x * factor).astype(o_ref.dtype)
        return

    width = caps_dim * num_segments
    sq = x * x                                                    # (T, W) VPU

    # Constant 0/1 selector (W, K): lane c belongs to capsule c // caps_dim.
    # (Built from iota + compares; no integer division, no XLU work.)
    c = jax.lax.broadcasted_iota(jnp.int32, (width, num_segments), 0)
    k = jax.lax.broadcasted_iota(jnp.int32, (width, num_segments), 1)
    lo = k * caps_dim
    sel = jnp.where((c >= lo) & (c < lo + caps_dim), 1.0, 0.0).astype(jnp.float32)

    # Segmented squared norms on the MXU: (T, W) @ (W, K) -> (T, K).
    sn = jnp.dot(sq, sel, preferred_element_type=jnp.float32)

    # sqrt + exact divide only on the narrow (T, K) column (off the per-element
    # path; exact divide keeps the 1e-5 tolerance vs. the reference).
    factor = sn / ((1.0 + sn) * (jnp.sqrt(sn) + eps))             # (T, K)

    # Broadcast the factor back to full width with the transposed selector
    # (built directly, no transpose op): (T, K) @ (K, W) -> (T, W).
    ct = jax.lax.broadcasted_iota(jnp.int32, (num_segments, width), 1)
    kt = jax.lax.broadcasted_iota(jnp.int32, (num_segments, width), 0)
    lot = kt * caps_dim
    sel_t = jnp.where((ct >= lot) & (ct < lot + caps_dim), 1.0, 0.0).astype(jnp.float32)
    factor_full = jnp.dot(factor, sel_t, preferred_element_type=jnp.float32)

    # Single full-width multiply and one unmasked full-width store.
    o_ref[...] = (x * factor_full).astype(o_ref.dtype)


def squash(x: jax.Array, eps: float = 1e-5, tile_rows: int | None = None) -> jax.Array:
    """Capsule squashing along the last axis of `x` (any leading dims)."""
    orig_shape = x.shape
    caps_dim = int(orig_shape[-1])
    rows = int(math.prod(orig_shape[:-1])) if len(orig_shape) > 1 else 1

    # --- lane packing: pack num_segments capsules per row (free contiguous reshape)
    base = 128 // math.gcd(caps_dim, 128)       # minimal segments for a lane-multiple width
    num_segments = 1
    for mult in (4, 2, 1):
        seg = base * mult
        w = caps_dim * seg
        if rows % seg != 0:
            continue
        if (mult > 1 and w <= _MAX_PACKED_WIDTH) or (mult == 1 and w <= _MAX_TOTAL_WIDTH):
            num_segments = seg
            break
    width = caps_dim * num_segments
    packed_rows = rows // num_segments
    x2d = x.reshape(packed_rows, width)         # contiguous regroup: no data movement

    # --- row-tile selection (multiple of 32 rows covers f32/bf16/int8 sublane tiling)
    itemsize = jnp.dtype(x.dtype).itemsize
    row_bytes = max(1, width * itemsize)
    if tile_rows is None:
        tr = (_TARGET_BLOCK_BYTES // row_bytes) // 32 * 32
        tr = max(32, min(tr, _MAX_TILE_ROWS))
        if packed_rows >= _MIN_BLOCKS * 32:     # keep a few blocks for megacore sharding
            tr = min(tr, _round_up(pl.cdiv(packed_rows, _MIN_BLOCKS), 32))
    else:
        tr = max(32, _round_up(int(tile_rows), 32))
    if tr >= packed_rows:
        tr = packed_rows                         # full-extent block: any size allowed

    # --- generation-aware VMEM budget (v7x has 64 MiB; v5e/v6e have 128 MiB)
    try:
        info = pltpu.get_tpu_info()
        vmem_cap = int(getattr(info, "vmem_capacity_bytes", 64 * 1024 * 1024))
    except Exception:  # pragma: no cover - conservative fallback
        vmem_cap = 64 * 1024 * 1024
    vmem_ceiling = int(vmem_cap * 0.6)

    def _working_set(rows_: int) -> int:
        blk = rows_ * width * itemsize
        # double-buffered in + out blocks, plus f32 in-kernel temporaries
        return 4 * blk + 3 * rows_ * width * 4

    while tr > 32 and _working_set(tr) > vmem_ceiling:
        new_tr = max(32, (tr // 2) // 32 * 32)
        if new_tr == tr:
            break
        tr = new_tr

    # --- prefer an even block count (2 TensorCores on v7x share the parallel axis)
    nblocks = pl.cdiv(packed_rows, tr)
    if tile_rows is None and nblocks > 1 and nblocks % 2 == 1:
        alt = _round_up(pl.cdiv(packed_rows, nblocks + 1), 32)
        if 32 <= alt < tr:
            tr = alt

    grid = (pl.cdiv(packed_rows, tr),)           # ragged tail handled by Pallas; no pad

    ws = _working_set(tr)
    vmem_limit = None
    if ws > 12 * 1024 * 1024:                    # beyond v5e's 16 MiB scoped default
        vmem_limit = int(min(ws + (4 << 20), int(vmem_cap * 0.9)))

    kernel = functools.partial(
        _squash_kernel, caps_dim=caps_dim, num_segments=num_segments, eps=float(eps)
    )

    out2d = pl.pallas_call(
        kernel,
        out_shape=jax.ShapeDtypeStruct((packed_rows, width), x.dtype),
        grid_spec=pltpu.PrefetchScalarGridSpec(
            num_scalar_prefetch=0,
            grid=grid,
            in_specs=[pl.BlockSpec((tr, width), lambda i: (i, 0))],
            out_specs=pl.BlockSpec((tr, width), lambda i: (i, 0)),
        ),
        compiler_params=pltpu.CompilerParams(
            dimension_semantics=("parallel",),
            vmem_limit_bytes=vmem_limit,
        ),
    )(x2d)

    return out2d.reshape(orig_shape)


def squash_reference(x: jax.Array, eps: float = 1e-5) -> jax.Array:
    x32 = x.astype(jnp.float32)
    squared_norm = jnp.sum(x32 * x32, axis=-1, keepdims=True)
    scale = squared_norm / (1.0 + squared_norm)
    return (scale * x32 / (jnp.sqrt(squared_norm) + eps)).astype(x.dtype)


if __name__ == "__main__":
    key = jax.random.PRNGKey(0)
    k1, k2, k3, k4 = jax.random.split(key, 4)

    # 1) Capsule-style input (batch=2, num_capsules=64, capsule_dim=32):
    #    packs 16 capsules per 512-lane row, MXU selector path, single block.
    x1 = jax.random.normal(k1, (2, 64, 32), dtype=jnp.float32)
    out1 = jax.block_until_ready(squash(x1))
    ref1 = squash_reference(x1)
    assert out1.shape == x1.shape, (out1.shape, x1.shape)
    assert jnp.allclose(out1, ref1, atol=1e-5, rtol=1e-5), "mismatch (packed MXU path)"

    # 2) Multi-block grid with ragged last block (forced small tile), caps_dim=16
    #    packs 8 capsules per 128-lane row.
    x2 = jax.random.normal(k2, (2, 300, 16), dtype=jnp.float32)
    out2 = jax.block_until_ready(squash(x2, tile_rows=32))
    ref2 = squash_reference(x2)
    assert out2.shape == x2.shape
    assert jnp.allclose(out2, ref2, atol=1e-5, rtol=1e-5), "mismatch (ragged multi-block)"

    # 3) Awkward caps_dim with row count that cannot pack -> num_segments=1 fallback
    #    (sub-128 lane width, plain row-reduction path).
    x3 = jax.random.normal(k3, (3, 5, 24), dtype=jnp.float32)
    out3 = jax.block_until_ready(squash(x3))
    ref3 = squash_reference(x3)
    assert out3.shape == x3.shape
    assert jnp.allclose(out3, ref3, atol=1e-5, rtol=1e-5), "mismatch (fallback path)"

    # 4) bf16 input, caps_dim=128 packs 4 capsules per 512-lane row.
    x4 = jax.random.normal(k4, (2, 4, 128), dtype=jnp.bfloat16)
    out4 = jax.block_until_ready(squash(x4))
    ref4 = squash_reference(x4)
    assert out4.shape == x4.shape
    assert jnp.allclose(out4.astype(jnp.float32), ref4.astype(jnp.float32),
                        atol=2e-2, rtol=2e-2), "mismatch (bf16 path)"

    print("KERNEL_OK")
</pallas_src>

<mosaic_0001>
module attributes {stable_mosaic.version = 11 : i64} {
  func.func @_squash_kernel(%arg0: i32, %arg1: memref<8x512xf32, #tpu.memory_space<vmem>>, %arg2: memref<8x512xf32, #tpu.memory_space<vmem>>) attributes {dimension_semantics = [#tpu.dimension_semantics<parallel>], iteration_bounds = array<i64: 1>, scalar_prefetch = 0 : i64, scratch_operands = 0 : i64, tpu.core_type = #tpu.core_type<tc>, window_params = [{transform_indices = @transform_0, window_bounds = array<i64: 8, 512>}, {transform_indices = @transform_1, window_bounds = array<i64: 8, 512>}]} {
    %c0 = arith.constant 0 : index
    %c0_0 = arith.constant 0 : index
    %0 = vector.load %arg1[%c0, %c0_0] : memref<8x512xf32, #tpu.memory_space<vmem>>, vector<8x512xf32>
    %1 = arith.mulf %0, %0 : vector<8x512xf32>
    %2 = tpu.iota {dimensions = array<i32: 0>} : vector<512x16xi32>
    %3 = tpu.iota {dimensions = array<i32: 1>} : vector<512x16xi32>
    %c32_i32 = arith.constant 32 : i32
    %4 = vector.broadcast %c32_i32 : i32 to vector<512x16xi32>
    %5 = arith.muli %3, %4 : vector<512x16xi32>
    %6 = arith.cmpi sge, %2, %5 : vector<512x16xi32>
    %c32_i32_1 = arith.constant 32 : i32
    %7 = vector.broadcast %c32_i32_1 : i32 to vector<512x16xi32>
    %8 = arith.addi %5, %7 : vector<512x16xi32>
    %9 = arith.cmpi slt, %2, %8 : vector<512x16xi32>
    %10 = arith.andi %6, %9 : vector<512x16xi1>
    %cst = arith.constant 1.000000e+00 : f32
    %cst_2 = arith.constant 0.000000e+00 : f32
    %11 = vector.broadcast %cst : f32 to vector<512x16xf32>
    %12 = vector.broadcast %cst_2 : f32 to vector<512x16xf32>
    %13 = arith.select %10, %11, %12 : vector<512x16xi1>, vector<512x16xf32>
    %cst_3 = arith.constant dense<0.000000e+00> : vector<8x16xf32>
    %14 = tpu.matmul %1, %13, %cst_3 {dimension_numbers = #tpu.dot_dimension_numbers<[1], [0], [0], [1], [0, 0, 1, 1], [], []>} : vector<8x512xf32>, vector<512x16xf32>, vector<8x16xf32> -> vector<8x16xf32>
    %cst_4 = arith.constant 1.000000e+00 : f32
    %15 = vector.broadcast %cst_4 : f32 to vector<8x16xf32>
    %16 = arith.addf %15, %14 : vector<8x16xf32>
    %17 = math.sqrt %14 : vector<8x16xf32>
    %cst_5 = arith.constant 9.99999974E-6 : f32
    %18 = vector.broadcast %cst_5 : f32 to vector<8x16xf32>
    %19 = arith.addf %17, %18 : vector<8x16xf32>
    %20 = arith.mulf %16, %19 : vector<8x16xf32>
    %21 = arith.divf %14, %20 : vector<8x16xf32>
    %22 = tpu.iota {dimensions = array<i32: 1>} : vector<16x512xi32>
    %23 = tpu.iota {dimensions = array<i32: 0>} : vector<16x512xi32>
    %c32_i32_6 = arith.constant 32 : i32
    %24 = vector.broadcast %c32_i32_6 : i32 to vector<16x512xi32>
    %25 = arith.muli %23, %24 : vector<16x512xi32>
    %26 = arith.cmpi sge, %22, %25 : vector<16x512xi32>
    %c32_i32_7 = arith.constant 32 : i32
    %27 = vector.broadcast %c32_i32_7 : i32 to vector<16x512xi32>
    %28 = arith.addi %25, %27 : vector<16x512xi32>
    %29 = arith.cmpi slt, %22, %28 : vector<16x512xi32>
    %30 = arith.andi %26, %29 : vector<16x512xi1>
    %cst_8 = arith.constant 1.000000e+00 : f32
    %cst_9 = arith.constant 0.000000e+00 : f32
    %31 = vector.broadcast %cst_8 : f32 to vector<16x512xf32>
    %32 = vector.broadcast %cst_9 : f32 to vector<16x512xf32>
    %33 = arith.select %30, %31, %32 : vector<16x512xi1>, vector<16x512xf32>
    %cst_10 = arith.constant dense<0.000000e+00> : vector<8x512xf32>
    %34 = tpu.matmul %21, %33, %cst_10 {dimension_numbers = #tpu.dot_dimension_numbers<[1], [0], [0], [1], [0, 0, 1, 1], [], []>} : vector<8x16xf32>, vector<16x512xf32>, vector<8x512xf32> -> vector<8x512xf32>
    %35 = arith.mulf %0, %34 : vector<8x512xf32>
    %c0_11 = arith.constant 0 : index
    %c0_12 = arith.constant 0 : index
    %36 = vector.load %arg2[%c0_11, %c0_12] : memref<8x512xf32, #tpu.memory_space<vmem>>, vector<8x512xf32>
    tpu.vector_store %arg2[%c0_11, %c0_12], %35 {strides = array<i32>} : memref<8x512xf32, #tpu.memory_space<vmem>>, vector<8x512xf32>,
    return
  }
  func.func @transform_0(%arg0: i32) -> (i32, i32) {
    %c0_i32 = arith.constant 0 : i32
    %c0_i32_0 = arith.constant 0 : i32
    return %arg0, %c0_i32 : i32, i32
  }
  func.func @transform_1(%arg0: i32) -> (i32, i32) {
    %c0_i32 = arith.constant 0 : i32
    %c0_i32_0 = arith.constant 0 : i32
    return %arg0, %c0_i32 : i32, i32
  }
}

</mosaic_0001>

<bundles_post_ra>
// kernel: tpu_custom_call.1
= control target key start
LH: loop header
LB: loop body
LE: loop exit
PB: predicated region body
PF: predicated region fallthrough
CT: control target
= control target key end

     0   :  { %6 = vsyncpa [#allocation3], 0  ;;  %s1296_s0 = inlined_call_operand.hbm [shape: f32[8,512], index: 0, kind: input, shape index: {}]   ;;  %s1297_s1 = inlined_call_operand.hbm [shape: f32[8,512], index: 1, kind: output, shape index: {}]  }
   0x1   :  { %7 = vsyncpa [#allocation4], 0  ;;  %s986_s6 = smov [#allocation2]   ;;  %s938_s10 = scalar_lea.hbm %s1296_s0, 512 }
   0x2   :  { %s14_s7 = sshll.u32 %s986_s6, 4  ;;  %p939_p0 = scmp.ne.s32.totalorder %s1296_s0, %s938_s10  ;;  %s15_s7 = int_to_ptr.vmem [resolvable:$true] %s14_s7 }
   0x3   :  { %p942_p1 = scmp.lt.u32.totalorder %s938_s10, %s1296_s0 }
   0x5   :  { %p944_p2 = pnand %p942_p1, %p939_p0 }
   0x7   :  { %947 = shalt.err (!%p944_p2)
}
   0x8   :  { %s948_s15 = scalar_lea.vmem %s15_s7, 512  ;;  %p953_p4 = scmp.lt.s32.totalorder %s15_s7, %s15_s7 }
   0x9   :  { %p949_p3 = scmp.ne.s32.totalorder %s15_s7, %s948_s15  ;;  %p954_p5 = scmp.lt.s32.totalorder %s948_s15, %s948_s15 }
   0xb   :  { %p955_p6 = por %p954_p5, %p953_p4 }
   0xd   :  { %p956_p7 = pnand %p955_p6, %p949_p3 }
   0xf   :  { %959 = shalt.err (!%p956_p7)
}
  0x10   :  { %17 = dma.hbm_to_vmem [thread:$0]  %s1296_s0, 512, %s15_s7, [#allocation3]   ;;  %v29_v0 = vlaneseq }
  0x11   :  { %982 = dma.done.wait [#allocation3], 512  }
  0x12   :  { %983 = vsyncadd [#allocation3], 4294966784  ;;  %v1012_v1 = vshrl.u32 %v29_v0, 7  ;;  %v1014_v2 = vand.u32 127, %v29_v0  ;;  %v987_v11 = vmov 1.0|1.0  }
  0x13   :  { %v1130_v37 = vld [vmem:[#allocation2 + $0x8] sm:$0xff]  ;;  %v1132_v38 = vld [vmem:[#allocation2 + $0x18] sm:$0xff]  ;;  %s989_s0 = smov [#allocation5]  }
  0x14   :  { %v46_v3 = vadd.s32 128, %v1012_v1  ;;  %v47_v4 = vadd.s32 136, %v1012_v1  ;;  %v1019_v5 = vmul.u32 32, %v1014_v2  ;;  %v78_v6 = vadd.s32 384, %v1012_v1  ;;  %s705_s18 = sshll.u32 %s989_s0, 4  ;;  %s706_s18 = int_to_ptr.vmem [resolvable:$true] %s705_s18 }
  0x15   :  { %v79_v8 = vadd.s32 392, %v1012_v1  ;;  %v1033_v9 = vadd.s32 8, %v1012_v1  ;;  %v62_v10 = vadd.s32 256, %v1012_v1  ;;  %v63_v12 = vadd.s32 264, %v1012_v1  ;;  %s960_s19 = scalar_lea.vmem %s706_s18, 512  ;;  %p965_p9 = scmp.lt.s32.totalorder %s706_s18, %s706_s18 }
  0x16   :  { %vm113_vm0 = vcmp.ge.s32.totalorder %v46_v3, %v1019_v5  ;;  %v1024_v7 = vadd.s32 32, %v1019_v5  ;;  %vm114_vm1 = vcmp.ge.s32.totalorder %v47_v4, %v1019_v5  ;;  %vm145_vm5 = vcmp.ge.s32.totalorder %v78_v6, %v1019_v5  ;;  %p961_p8 = scmp.ne.s32.totalorder %s706_s18, %s960_s19  ;;  %p966_p10 = scmp.lt.s32.totalorder %s960_s19, %s960_s19 }
  0x17   :  { %vm146_vm8 = vcmp.ge.s32.totalorder %v79_v8, %v1019_v5  ;;  %vm97_vm12 = vcmp.ge.s32.totalorder %v1012_v1, %v1019_v5  ;;  %vm98_vm15 = vcmp.ge.s32.totalorder %v1033_v9, %v1019_v5  ;;  %v48_v13 = vadd.s32 144, %v1012_v1 }
  0x18   :  { %vm178_vm2 = vcmp.lt.s32.totalorder %v46_v3, %v1024_v7  ;;  %vm179_vm3 = vcmp.lt.s32.totalorder %v47_v4, %v1024_v7  ;;  %vm210_vm6 = vcmp.lt.s32.totalorder %v78_v6, %v1024_v7  ;;  %vm211_vm9 = vcmp.lt.s32.totalorder %v79_v8, %v1024_v7  ;;  %p967_p11 = por %p966_p10, %p965_p9 }
  0x19   :  { %vm242_vm4 = vmand %vm113_vm0, %vm178_vm2  ;;  %vm162_vm13 = vcmp.lt.s32.totalorder %v1012_v1, %v1024_v7  ;;  %vm163_vm0 = vcmp.lt.s32.totalorder %v1033_v9, %v1024_v7  ;;  %v49_v14 = vadd.s32 152, %v1012_v1  ;;  %v80_v15 = vadd.s32 400, %v1012_v1 }
  0x1a   :  { %vm243_vm7 = vmand %vm114_vm1, %vm179_vm3  ;;  %vm129_vm3 = vcmp.ge.s32.totalorder %v62_v10, %v1019_v5  ;;  %v81_v16 = vadd.s32 408, %v1012_v1  ;;  %v32_v17 = vadd.s32 16, %v1012_v1  ;;  %v33_v18 = vadd.s32 24, %v1012_v1  ;;  %p968_p12 = pnand %p967_p11, %p961_p8 }
  0x1b   :  { %vm858_vm10 = vmpackc.low %vm243_vm7, %vm242_vm4  ;;  %vm194_vm4 = vcmp.lt.s32.totalorder %v62_v10, %v1024_v7  ;;  %vm195_vm7 = vcmp.lt.s32.totalorder %v63_v12, %v1024_v7  ;;  %v64_v19 = vadd.s32 272, %v1012_v1  ;;  %v65_v20 = vadd.s32 280, %v1012_v1 }
  0x1c   :  { %859 = vmatprep.subr.msk.bf16.mxu0 %vm858_vm10, %v987_v11  ;;  %vm274_vm11 = vmand %vm145_vm5, %vm210_vm6  ;;  %vm130_vm6 = vcmp.ge.s32.totalorder %v63_v12, %v1019_v5  ;;  %vm115_vm10 = vcmp.ge.s32.totalorder %v48_v13, %v1019_v5  ;;  %v50_v21 = vadd.s32 160, %v1012_v1  ;;  %v51_v22 = vadd.s32 168, %v1012_v1 }
  0x1d   :  { %vm275_vm14 = vmand %vm146_vm8, %vm211_vm9  ;;  %v82_v23 = vadd.s32 416, %v1012_v1  ;;  %v83_v24 = vadd.s32 424, %v1012_v1  ;;  %v34_v25 = vadd.s32 32, %v1012_v1  ;;  %v35_v26 = vadd.s32 40, %v1012_v1 }
  0x1e   :  { %vm890_vm1 = vmpackc.low %vm275_vm14, %vm274_vm11  ;;  %vm180_vm11 = vcmp.lt.s32.totalorder %v48_v13, %v1024_v7  ;;  %vm181_vm14 = vcmp.lt.s32.totalorder %v49_v14, %v1024_v7  ;;  %v66_v27 = vadd.s32 288, %v1012_v1  ;;  %v67_v28 = vadd.s32 296, %v1012_v1 }
  0x1f   :  { %891 = vmatprep.subr.msk.bf16.mxu1 %vm890_vm1, %v987_v11  ;;  %vm226_vm2 = vmand %vm97_vm12, %vm162_vm13  ;;  %vm116_vm13 = vcmp.ge.s32.totalorder %v49_v14, %v1019_v5  ;;  %vm147_vm1 = vcmp.ge.s32.totalorder %v80_v15, %v1019_v5  ;;  %v52_v29 = vadd.s32 176, %v1012_v1  ;;  %v53_v30 = vadd.s32 184, %v1012_v1 }
  0x20   :  { %vm227_vm5 = vmand %vm98_vm15, %vm163_vm0  ;;  %v84_v31 = vadd.s32 432, %v1012_v1  ;;  %v85_v32 = vadd.s32 440, %v1012_v1  ;;  %v36_v33 = vadd.s32 48, %v1012_v1  ;;  %v37_v34 = vadd.s32 56, %v1012_v1 }
  0x21   :  { %vm860_vm8 = vmpackc.low %vm227_vm5, %vm226_vm2  ;;  %vm212_vm2 = vcmp.lt.s32.totalorder %v80_v15, %v1024_v7  ;;  %vm213_vm5 = vcmp.lt.s32.totalorder %v81_v16, %v1024_v7  ;;  %v68_v35 = vadd.s32 304, %v1012_v1  ;;  %v69_v36 = vadd.s32 312, %v1012_v1  ;;  %v1252_v15 = vld [vmem:[#allocation2] sm:$0xff] }
  0x22   :  { %861 = vmatpush3.bf16.msk.msra.mxu0 %vm860_vm8, %v987_v11  ;;  %vm258_vm9 = vmand %vm129_vm3, %vm194_vm4  ;;  %vm148_vm4 = vcmp.ge.s32.totalorder %v81_v16, %v1019_v5  ;;  %vm99_vm8 = vcmp.ge.s32.totalorder %v32_v17, %v1019_v5  ;;  %v54_v39 = vadd.s32 192, %v1012_v1  ;;  %v55_v40 = vadd.s32 200, %v1012_v1 }
  0x23   :  { %vm259_vm12 = vmand %vm130_vm6, %vm195_vm7  ;;  %v26_v41 = vmul.f32 %v1130_v37, %v1130_v37  ;;  %v28_v42 = vmul.f32 %v1132_v38, %v1132_v38  ;;  %v86_v43 = vadd.s32 448, %v1012_v1  ;;  %v87_v44 = vadd.s32 456, %v1012_v1 }
  0x24   :  { %vm892_vm15 = vmpackc.low %vm259_vm12, %vm258_vm9  ;;  %vm164_vm9 = vcmp.lt.s32.totalorder %v32_v17, %v1024_v7  ;;  %vm165_vm12 = vcmp.lt.s32.totalorder %v33_v18, %v1024_v7  ;;  %v38_v45 = vadd.s32 64, %v1012_v1  ;;  %v39_v46 = vadd.s32 72, %v1012_v1  ;;  %v1261_v17 = vld [vmem:[#allocation2 + $0x10] sm:$0xff] }
  0x25   :  { %893 = vmatpush3.bf16.msk.msra.mxu1 %vm892_vm15, %v987_v11  ;;  %vm244_vm0 = vmand %vm115_vm10, %vm180_vm11  ;;  %vm100_vm11 = vcmp.ge.s32.totalorder %v33_v18, %v1019_v5  ;;  %vm131_vm15 = vcmp.ge.s32.totalorder %v64_v19, %v1019_v5  ;;  %418 = vmatprep.mubr.f32.mxu0 %v26_v41  ;;  %v70_v47 = vadd.s32 320, %v1012_v1  ;;  %v71_v48 = vadd.s32 328, %v1012_v1 }
  0x26   :  { %vm245_vm3 = vmand %vm116_vm13, %vm181_vm14  ;;  %488 = vmatprep.mubr.f32.mxu1 %v28_v42  ;;  %v56_v49 = vadd.s32 208, %v1012_v1  ;;  %v57_v50 = vadd.s32 216, %v1012_v1  ;;  %v88_v51 = vadd.s32 464, %v1012_v1  ;;  %v89_v52 = vadd.s32 472, %v1012_v1 }
  0x27   :  { %vm862_vm6 = vmpackc.low %vm245_vm3, %vm244_vm0  ;;  %vm196_vm0 = vcmp.lt.s32.totalorder %v64_v19, %v1024_v7  ;;  %vm197_vm3 = vcmp.lt.s32.totalorder %v65_v20, %v1024_v7  ;;  %v40_v53 = vadd.s32 80, %v1012_v1  ;;  %v41_v54 = vadd.s32 88, %v1012_v1 }
  0x28   :  { %863 = vmatprep.subr.msk.bf16.mxu0 %vm862_vm6, %v987_v11  ;;  %vm276_vm7 = vmand %vm147_vm1, %vm212_vm2  ;;  %vm132_vm2 = vcmp.ge.s32.totalorder %v65_v20, %v1019_v5  ;;  %vm117_vm6 = vcmp.ge.s32.totalorder %v50_v21, %v1019_v5  ;;  %v72_v55 = vadd.s32 336, %v1012_v1  ;;  %v73_v56 = vadd.s32 344, %v1012_v1 }
  0x29   :  { %vm277_vm10 = vmand %vm148_vm4, %vm213_vm5  ;;  %v58_v57 = vadd.s32 224, %v1012_v1  ;;  %v59_v58 = vadd.s32 232, %v1012_v1  ;;  %v90_v59 = vadd.s32 480, %v1012_v1  ;;  %v91_v60 = vadd.s32 488, %v1012_v1 }
  0x2a   :  { %vm894_vm13 = vmpackc.low %vm277_vm10, %vm276_vm7  ;;  %vm182_vm7 = vcmp.lt.s32.totalorder %v50_v21, %v1024_v7  ;;  %vm183_vm10 = vcmp.lt.s32.totalorder %v51_v22, %v1024_v7  ;;  %v42_v61 = vadd.s32 96, %v1012_v1  ;;  %v43_v62 = vadd.s32 104, %v1012_v1 }
  0x2b   :  { %895 = vmatprep.subr.msk.bf16.mxu1 %vm894_vm13, %v987_v11  ;;  %vm228_vm14 = vmand %vm99_vm8, %vm164_vm9  ;;  %vm118_vm9 = vcmp.ge.s32.totalorder %v51_v22, %v1019_v5  ;;  %vm149_vm13 = vcmp.ge.s32.totalorder %v82_v23, %v1019_v5  ;;  %v74_v63 = vadd.s32 352, %v1012_v1  ;;  %v75_v0 = vadd.s32 360, %v1012_v1 }
  0x2c   :  { %vm229_vm1 = vmand %vm100_vm11, %vm165_vm12  ;;  %v60_v3 = vadd.s32 240, %v1012_v1  ;;  %v61_v4 = vadd.s32 248, %v1012_v1  ;;  %v92_v6 = vadd.s32 496, %v1012_v1  ;;  %v93_v8 = vadd.s32 504, %v1012_v1 }
  0x2d   :  { %vm864_vm4 = vmpackc.low %vm229_vm1, %vm228_vm14  ;;  %vm214_vm14 = vcmp.lt.s32.totalorder %v82_v23, %v1024_v7  ;;  %vm215_vm1 = vcmp.lt.s32.totalorder %v83_v24, %v1024_v7  ;;  %v44_v10 = vadd.s32 112, %v1012_v1  ;;  %v45_v12 = vadd.s32 120, %v1012_v1 }
  0x2e   :  { %865 = vmatpush3.bf16.msk.msra.mxu0 %vm864_vm4, %v987_v11  ;;  %vm260_vm5 = vmand %vm131_vm15, %vm196_vm0  ;;  %vm150_vm0 = vcmp.ge.s32.totalorder %v83_v24, %v1019_v5  ;;  %vm101_vm4 = vcmp.ge.s32.totalorder %v34_v25, %v1019_v5  ;;  %v76_v13 = vadd.s32 368, %v1012_v1  ;;  %v77_v14 = vadd.s32 376, %v1012_v1 }
  0x2f   :  { %vm261_vm8 = vmand %vm132_vm2, %vm197_vm3  ;;  %v25_v16 = vmul.f32 %v1252_v15, %v1252_v15  ;;  %v27_v18 = vmul.f32 %v1261_v17, %v1261_v17  ;;  %v509_v19 = vmul.u32 32, %v1012_v1  ;;  %v508_v21 = vadd.s32 384, %v1014_v2 }
  0x30   :  { %vm896_vm11 = vmpackc.low %vm261_vm8, %vm260_vm5  ;;  %vm166_vm5 = vcmp.lt.s32.totalorder %v34_v25, %v1024_v7  ;;  %vm167_vm8 = vcmp.lt.s32.totalorder %v35_v26, %v1024_v7  ;;  %v988_v23 = vmov 0.0   ;;  %v507_v1 = vadd.s32 256, %v1014_v2 }
  0x31   :  { %897 = vmatpush3.bf16.msk.msra.mxu1 %vm896_vm11, %v987_v11  ;;  %vm246_vm12 = vmand %vm117_vm6, %vm182_vm7  ;;  %vm102_vm7 = vcmp.ge.s32.totalorder %v35_v26, %v1019_v5  ;;  %vm133_vm11 = vcmp.ge.s32.totalorder %v66_v27, %v1019_v5  ;;  %v519_v22 = vadd.s32 32, %v509_v19 }
  0x32   :  { %vm247_vm15 = vmand %vm118_vm9, %vm183_vm10 }
  0x33   :  { %vm866_vm2 = vmpackc.low %vm247_vm15, %vm246_vm12  ;;  %vm198_vm12 = vcmp.lt.s32.totalorder %v66_v27, %v1024_v7  ;;  %vm199_vm15 = vcmp.lt.s32.totalorder %v67_v28, %v1024_v7 }
  0x34   :  { %867 = vmatprep.subr.msk.bf16.mxu0 %vm866_vm2, %v987_v11  ;;  %vm278_vm3 = vmand %vm149_vm13, %vm214_vm14  ;;  %vm134_vm14 = vcmp.ge.s32.totalorder %v67_v28, %v1019_v5  ;;  %vm119_vm2 = vcmp.ge.s32.totalorder %v52_v29, %v1019_v5 }
  0x35   :  { %vm279_vm6 = vmand %vm150_vm0, %vm215_vm1 }
  0x36   :  { %vm898_vm9 = vmpackc.low %vm279_vm6, %vm278_vm3  ;;  %vm184_vm3 = vcmp.lt.s32.totalorder %v52_v29, %v1024_v7  ;;  %vm185_vm6 = vcmp.lt.s32.totalorder %v53_v30, %v1024_v7 }
  0x37   :  { %899 = vmatprep.subr.msk.bf16.mxu1 %vm898_vm9, %v987_v11  ;;  %vm230_vm10 = vmand %vm101_vm4, %vm166_vm5  ;;  %vm120_vm5 = vcmp.ge.s32.totalorder %v53_v30, %v1019_v5  ;;  %vm151_vm9 = vcmp.ge.s32.totalorder %v84_v31, %v1019_v5 }
  0x38   :  { %vm231_vm13 = vmand %vm102_vm7, %vm167_vm8 }
  0x39   :  { %vm868_vm0 = vmpackc.low %vm231_vm13, %vm230_vm10  ;;  %vm216_vm10 = vcmp.lt.s32.totalorder %v84_v31, %v1024_v7  ;;  %vm217_vm13 = vcmp.lt.s32.totalorder %v85_v32, %v1024_v7 }
  0x3a   :  { %869 = vmatpush3.bf16.msk.msra.mxu0 %vm868_vm0, %v987_v11  ;;  %vm262_vm1 = vmand %vm133_vm11, %vm198_vm12  ;;  %vm152_vm12 = vcmp.ge.s32.totalorder %v85_v32, %v1019_v5  ;;  %vm103_vm0 = vcmp.ge.s32.totalorder %v36_v33, %v1019_v5 }
  0x3b   :  { %vm263_vm4 = vmand %vm134_vm14, %vm199_vm15 }
  0x3c   :  { %vm900_vm7 = vmpackc.low %vm263_vm4, %vm262_vm1  ;;  %vm168_vm1 = vcmp.lt.s32.totalorder %v36_v33, %v1024_v7  ;;  %vm169_vm4 = vcmp.lt.s32.totalorder %v37_v34, %v1024_v7 }
  0x3d   :  { %901 = vmatpush3.bf16.msk.msra.mxu1 %vm900_vm7, %v987_v11  ;;  %vm248_vm8 = vmand %vm119_vm2, %vm184_vm3  ;;  %vm104_vm3 = vcmp.ge.s32.totalorder %v37_v34, %v1019_v5  ;;  %vm135_vm7 = vcmp.ge.s32.totalorder %v68_v35, %v1019_v5 }
  0x3e   :  { %vm249_vm11 = vmand %vm120_vm5, %vm185_vm6 }
  0x3f   :  { %vm870_vm14 = vmpackc.low %vm249_vm11, %vm248_vm8  ;;  %vm200_vm8 = vcmp.lt.s32.totalorder %v68_v35, %v1024_v7  ;;  %vm201_vm11 = vcmp.lt.s32.totalorder %v69_v36, %v1024_v7 }
  0x40   :  { %871 = vmatprep.subr.msk.bf16.mxu0 %vm870_vm14, %v987_v11  ;;  %vm280_vm15 = vmand %vm151_vm9, %vm216_vm10  ;;  %vm136_vm10 = vcmp.ge.s32.totalorder %v69_v36, %v1019_v5  ;;  %vm121_vm14 = vcmp.ge.s32.totalorder %v54_v39, %v1019_v5 }
  0x41   :  { %vm281_vm2 = vmand %vm152_vm12, %vm217_vm13 }
  0x42   :  { %vm902_vm5 = vmpackc.low %vm281_vm2, %vm280_vm15  ;;  %vm186_vm15 = vcmp.lt.s32.totalorder %v54_v39, %v1024_v7  ;;  %vm187_vm2 = vcmp.lt.s32.totalorder %v55_v40, %v1024_v7 }
  0x43   :  { %903 = vmatprep.subr.msk.bf16.mxu1 %vm902_vm5, %v987_v11  ;;  %vm232_vm6 = vmand %vm103_vm0, %vm168_vm1  ;;  %vm122_vm1 = vcmp.ge.s32.totalorder %v55_v40, %v1019_v5  ;;  %vm153_vm5 = vcmp.ge.s32.totalorder %v86_v43, %v1019_v5 }
  0x44   :  { %vm233_vm9 = vmand %vm104_vm3, %vm169_vm4 }
  0x45   :  { %vm872_vm12 = vmpackc.low %vm233_vm9, %vm232_vm6  ;;  %vm218_vm6 = vcmp.lt.s32.totalorder %v86_v43, %v1024_v7  ;;  %vm219_vm9 = vcmp.lt.s32.totalorder %v87_v44, %v1024_v7 }
  0x46   :  { %873 = vmatpush3.bf16.msk.msra.mxu0 %vm872_vm12, %v987_v11  ;;  %vm264_vm13 = vmand %vm135_vm7, %vm200_vm8  ;;  %vm154_vm8 = vcmp.ge.s32.totalorder %v87_v44, %v1019_v5  ;;  %vm105_vm12 = vcmp.ge.s32.totalorder %v38_v45, %v1019_v5 }
  0x47   :  { %vm265_vm0 = vmand %vm136_vm10, %vm201_vm11 }
  0x48   :  { %vm904_vm3 = vmpackc.low %vm265_vm0, %vm264_vm13  ;;  %vm170_vm13 = vcmp.lt.s32.totalorder %v38_v45, %v1024_v7  ;;  %vm171_vm0 = vcmp.lt.s32.totalorder %v39_v46, %v1024_v7 }
  0x49   :  { %905 = vmatpush3.bf16.msk.msra.mxu1 %vm904_vm3, %v987_v11  ;;  %vm250_vm4 = vmand %vm121_vm14, %vm186_vm15  ;;  %vm106_vm15 = vcmp.ge.s32.totalorder %v39_v46, %v1019_v5  ;;  %vm137_vm3 = vcmp.ge.s32.totalorder %v70_v47, %v1019_v5 }
  0x4a   :  { %vm251_vm7 = vmand %vm122_vm1, %vm187_vm2 }
  0x4b   :  { %vm874_vm10 = vmpackc.low %vm251_vm7, %vm250_vm4  ;;  %vm202_vm4 = vcmp.lt.s32.totalorder %v70_v47, %v1024_v7  ;;  %vm203_vm7 = vcmp.lt.s32.totalorder %v71_v48, %v1024_v7 }
  0x4c   :  { %875 = vmatprep.subr.msk.bf16.mxu0 %vm874_vm10, %v987_v11  ;;  %vm282_vm11 = vmand %vm153_vm5, %vm218_vm6  ;;  %vm138_vm6 = vcmp.ge.s32.totalorder %v71_v48, %v1019_v5  ;;  %vm123_vm10 = vcmp.ge.s32.totalorder %v56_v49, %v1019_v5 }
  0x4d   :  { %vm283_vm14 = vmand %vm154_vm8, %vm219_vm9 }
  0x4e   :  { %vm906_vm1 = vmpackc.low %vm283_vm14, %vm282_vm11  ;;  %vm188_vm11 = vcmp.lt.s32.totalorder %v56_v49, %v1024_v7  ;;  %vm189_vm14 = vcmp.lt.s32.totalorder %v57_v50, %v1024_v7 }
  0x4f   :  { %907 = vmatprep.subr.msk.bf16.mxu1 %vm906_vm1, %v987_v11  ;;  %vm234_vm2 = vmand %vm105_vm12, %vm170_vm13  ;;  %vm124_vm13 = vcmp.ge.s32.totalorder %v57_v50, %v1019_v5  ;;  %vm155_vm1 = vcmp.ge.s32.totalorder %v88_v51, %v1019_v5 }
  0x50   :  { %vm235_vm5 = vmand %vm106_vm15, %vm171_vm0 }
  0x51   :  { %vm876_vm8 = vmpackc.low %vm235_vm5, %vm234_vm2  ;;  %vm220_vm2 = vcmp.lt.s32.totalorder %v88_v51, %v1024_v7  ;;  %vm221_vm5 = vcmp.lt.s32.totalorder %v89_v52, %v1024_v7 }
  0x52   :  { %877 = vmatpush3.bf16.msk.msra.mxu0 %vm876_vm8, %v987_v11  ;;  %vm266_vm9 = vmand %vm137_vm3, %vm202_vm4  ;;  %vm156_vm4 = vcmp.ge.s32.totalorder %v89_v52, %v1019_v5  ;;  %vm107_vm8 = vcmp.ge.s32.totalorder %v40_v53, %v1019_v5 }
  0x53   :  { %vm267_vm12 = vmand %vm138_vm6, %vm203_vm7 }
  0x54   :  { %vm908_vm15 = vmpackc.low %vm267_vm12, %vm266_vm9  ;;  %vm172_vm9 = vcmp.lt.s32.totalorder %v40_v53, %v1024_v7  ;;  %vm173_vm12 = vcmp.lt.s32.totalorder %v41_v54, %v1024_v7 }
  0x55   :  { %909 = vmatpush3.bf16.msk.msra.mxu1 %vm908_vm15, %v987_v11  ;;  %vm252_vm0 = vmand %vm123_vm10, %vm188_vm11  ;;  %vm108_vm11 = vcmp.ge.s32.totalorder %v41_v54, %v1019_v5  ;;  %vm139_vm15 = vcmp.ge.s32.totalorder %v72_v55, %v1019_v5 }
  0x56   :  { %vm253_vm3 = vmand %vm124_vm13, %vm189_vm14 }
  0x57   :  { %vm878_vm6 = vmpackc.low %vm253_vm3, %vm252_vm0  ;;  %vm204_vm0 = vcmp.lt.s32.totalorder %v72_v55, %v1024_v7  ;;  %vm205_vm3 = vcmp.lt.s32.totalorder %v73_v56, %v1024_v7 }
  0x58   :  { %879 = vmatprep.subr.msk.bf16.mxu0 %vm878_vm6, %v987_v11  ;;  %vm284_vm7 = vmand %vm155_vm1, %vm220_vm2  ;;  %vm140_vm2 = vcmp.ge.s32.totalorder %v73_v56, %v1019_v5  ;;  %vm125_vm6 = vcmp.ge.s32.totalorder %v58_v57, %v1019_v5 }
  0x59   :  { %vm285_vm10 = vmand %vm156_vm4, %vm221_vm5 }
  0x5a   :  { %vm910_vm13 = vmpackc.low %vm285_vm10, %vm284_vm7  ;;  %vm190_vm7 = vcmp.lt.s32.totalorder %v58_v57, %v1024_v7  ;;  %vm191_vm10 = vcmp.lt.s32.totalorder %v59_v58, %v1024_v7 }
  0x5b   :  { %911 = vmatprep.subr.msk.bf16.mxu1 %vm910_vm13, %v987_v11  ;;  %vm236_vm14 = vmand %vm107_vm8, %vm172_vm9  ;;  %vm126_vm9 = vcmp.ge.s32.totalorder %v59_v58, %v1019_v5  ;;  %vm157_vm13 = vcmp.ge.s32.totalorder %v90_v59, %v1019_v5 }
  0x5c   :  { %vm237_vm1 = vmand %vm108_vm11, %vm173_vm12 }
  0x5d   :  { %vm880_vm4 = vmpackc.low %vm237_vm1, %vm236_vm14  ;;  %vm222_vm14 = vcmp.lt.s32.totalorder %v90_v59, %v1024_v7  ;;  %vm223_vm1 = vcmp.lt.s32.totalorder %v91_v60, %v1024_v7 }
  0x5e   :  { %881 = vmatpush3.bf16.msk.msra.mxu0 %vm880_vm4, %v987_v11  ;;  %vm268_vm5 = vmand %vm139_vm15, %vm204_vm0  ;;  %vm158_vm0 = vcmp.ge.s32.totalorder %v91_v60, %v1019_v5  ;;  %vm109_vm4 = vcmp.ge.s32.totalorder %v42_v61, %v1019_v5 }
  0x5f   :  { %vm269_vm8 = vmand %vm140_vm2, %vm205_vm3 }
  0x60   :  { %vm912_vm11 = vmpackc.low %vm269_vm8, %vm268_vm5  ;;  %vm174_vm5 = vcmp.lt.s32.totalorder %v42_v61, %v1024_v7  ;;  %vm175_vm8 = vcmp.lt.s32.totalorder %v43_v62, %v1024_v7 }
  0x61   :  { %913 = vmatpush3.bf16.msk.msra.mxu1 %vm912_vm11, %v987_v11  ;;  %vm254_vm12 = vmand %vm125_vm6, %vm190_vm7  ;;  %vm110_vm7 = vcmp.ge.s32.totalorder %v43_v62, %v1019_v5  ;;  %vm141_vm11 = vcmp.ge.s32.totalorder %v74_v63, %v1019_v5 }
  0x62   :  { %vm255_vm15 = vmand %vm126_vm9, %vm191_vm10 }
  0x63   :  { %vm882_vm2 = vmpackc.low %vm255_vm15, %vm254_vm12  ;;  %vm206_vm12 = vcmp.lt.s32.totalorder %v74_v63, %v1024_v7  ;;  %vm207_vm15 = vcmp.lt.s32.totalorder %v75_v0, %v1024_v7 }
  0x64   :  { %883 = vmatprep.subr.msk.bf16.mxu0 %vm882_vm2, %v987_v11  ;;  %vm286_vm3 = vmand %vm157_vm13, %vm222_vm14  ;;  %vm142_vm14 = vcmp.ge.s32.totalorder %v75_v0, %v1019_v5  ;;  %vm127_vm2 = vcmp.ge.s32.totalorder %v60_v3, %v1019_v5 }
  0x65   :  { %vm287_vm6 = vmand %vm158_vm0, %vm223_vm1 }
  0x66   :  { %vm914_vm9 = vmpackc.low %vm287_vm6, %vm286_vm3  ;;  %vm192_vm3 = vcmp.lt.s32.totalorder %v60_v3, %v1024_v7  ;;  %vm193_vm6 = vcmp.lt.s32.totalorder %v61_v4, %v1024_v7 }
  0x67   :  { %915 = vmatprep.subr.msk.bf16.mxu1 %vm914_vm9, %v987_v11  ;;  %vm238_vm10 = vmand %vm109_vm4, %vm174_vm5  ;;  %vm128_vm5 = vcmp.ge.s32.totalorder %v61_v4, %v1019_v5  ;;  %vm159_vm9 = vcmp.ge.s32.totalorder %v92_v6, %v1019_v5 }
  0x68   :  { %vm239_vm13 = vmand %vm110_vm7, %vm175_vm8 }
  0x69   :  { %vm884_vm0 = vmpackc.low %vm239_vm13, %vm238_vm10  ;;  %vm224_vm10 = vcmp.lt.s32.totalorder %v92_v6, %v1024_v7  ;;  %vm225_vm13 = vcmp.lt.s32.totalorder %v93_v8, %v1024_v7 }
  0x6a   :  { %885 = vmatpush3.bf16.msk.msra.mxu0 %vm884_vm0, %v987_v11  ;;  %vm270_vm1 = vmand %vm141_vm11, %vm206_vm12  ;;  %vm160_vm12 = vcmp.ge.s32.totalorder %v93_v8, %v1019_v5  ;;  %vm111_vm0 = vcmp.ge.s32.totalorder %v44_v10, %v1019_v5 }
  0x6b   :  { %vm271_vm4 = vmand %vm142_vm14, %vm207_vm15 }
  0x6c   :  { %vm916_vm7 = vmpackc.low %vm271_vm4, %vm270_vm1  ;;  %vm176_vm1 = vcmp.lt.s32.totalorder %v44_v10, %v1024_v7  ;;  %vm177_vm4 = vcmp.lt.s32.totalorder %v45_v12, %v1024_v7 }
  0x6d   :  { %917 = vmatpush3.bf16.msk.msra.mxu1 %vm916_vm7, %v987_v11  ;;  %vm256_vm8 = vmand %vm127_vm2, %vm192_vm3  ;;  %vm112_vm3 = vcmp.ge.s32.totalorder %v45_v12, %v1019_v5  ;;  %vm143_vm7 = vcmp.ge.s32.totalorder %v76_v13, %v1019_v5 }
  0x6e   :  { %vm257_vm11 = vmand %vm128_vm5, %vm193_vm6 }
  0x6f   :  { %vm886_vm14 = vmpackc.low %vm257_vm11, %vm256_vm8  ;;  %vm208_vm8 = vcmp.lt.s32.totalorder %v76_v13, %v1024_v7  ;;  %vm209_vm11 = vcmp.lt.s32.totalorder %v77_v14, %v1024_v7  ;;  %v506_v7 = vadd.s32 128, %v1014_v2 }
  0x70   :  { %887 = vmatprep.subr.msk.bf16.mxu0 %vm886_vm14, %v987_v11  ;;  %vm288_vm15 = vmand %vm159_vm9, %vm224_vm10  ;;  %vm144_vm10 = vcmp.ge.s32.totalorder %v77_v14, %v1019_v5  ;;  %v510_v5 = vmul.u32 32, %v1033_v9 }
  0x71   :  { %vm289_vm2 = vmand %vm160_vm12, %vm225_vm13 }
  0x72   :  { %vm918_vm5 = vmpackc.low %vm289_vm2, %vm288_vm15  ;;  %v520_v20 = vadd.s32 32, %v510_v5 }
  0x73   :  { %919 = vmatprep.subr.msk.bf16.mxu1 %vm918_vm5, %v987_v11  ;;  %vm240_vm6 = vmand %vm111_vm0, %vm176_vm1  ;;  %vm512_vm0 = vcmp.ge.s32.totalorder %v506_v7, %v509_v19  ;;  %vm516_vm1 = vcmp.ge.s32.totalorder %v506_v7, %v510_v5 }
  0x74   :  { %vm241_vm9 = vmand %vm112_vm3, %vm177_vm4  ;;  %vm526_vm2 = vcmp.lt.s32.totalorder %v506_v7, %v520_v20  ;;  %vm518_vm4 = vcmp.ge.s32.totalorder %v508_v21, %v510_v5  ;;  %vm528_vm5 = vcmp.lt.s32.totalorder %v508_v21, %v520_v20 }
  0x75   :  { %vm888_vm12 = vmpackc.low %vm241_vm9, %vm240_vm6  ;;  %vm522_vm6 = vcmp.lt.s32.totalorder %v506_v7, %v519_v22 }
  0x76   :  { %889 = vmatpush3.bf16.msk.msra.mxu0 %vm888_vm12, %v987_v11  ;;  %vm272_vm13 = vmand %vm143_vm7, %vm208_vm8  ;;  %vm514_vm7 = vcmp.ge.s32.totalorder %v508_v21, %v509_v19  ;;  %vm524_vm8 = vcmp.lt.s32.totalorder %v508_v21, %v519_v22  ;;  %vm511_vm12 = vcmp.ge.s32.totalorder %v1014_v2, %v509_v19 }
  0x77   :  { %vm273_vm14 = vmand %vm144_vm10, %vm209_vm11 }
  0x78   :  { %vm920_vm15 = vmpackc.low %vm273_vm14, %vm272_vm13  ;;  %vm521_vm13 = vcmp.lt.s32.totalorder %v1014_v2, %v519_v22 }
  0x79   :  { %921 = vmatpush3.bf16.msk.msra.mxu1 %vm920_vm15, %v987_v11  ;;  %419 = vmatmul.mubr.f32.vlgmr.msra.gmra.mrb[0].mxu0 %v25_v16  ;;  %vm534_vm3 = vmand %vm516_vm1, %vm526_vm2  ;;  %vm515_vm15 = vcmp.ge.s32.totalorder %v1014_v2, %v510_v5  ;;  %vm525_vm1 = vcmp.lt.s32.totalorder %v1014_v2, %v520_v20 }
  0x7a   :  { %613 = vmatprep.mubr.f32.mxu0 %v988_v23  ;;  %vm536_vm9 = vmand %vm518_vm4, %vm528_vm5  ;;  %vm513_vm5 = vcmp.ge.s32.totalorder %v507_v1, %v509_v19 }
  0x7b   :  { %vm530_vm10 = vmand %vm512_vm0, %vm522_vm6  ;;  %vm523_vm0 = vcmp.lt.s32.totalorder %v507_v1, %v519_v22 }
  0x7c   :  { %489 = vmatmul.mubr.f32.vlgmr.msra.gmra.mrb[0].mxu1 %v27_v18  ;;  %vm922_vm11 = vmpackc.low %vm534_vm3, %vm530_vm10  ;;  %vm517_vm3 = vcmp.ge.s32.totalorder %v507_v1, %v510_v5  ;;  %vm527_vm10 = vcmp.lt.s32.totalorder %v507_v1, %v520_v20 }
  0x7d   :  { %684 = vmatprep.mubr.f32.mxu1 %v988_v23  ;;  %923 = vmatprep.subr.msk.bf16.mxu0 %vm922_vm11, %v987_v11  ;;  %vm532_vm14 = vmand %vm514_vm7, %vm524_vm8 }
  0x7e   :  { %vm926_vm2 = vmpackc.low %vm536_vm9, %vm532_vm14  ;;  %vm545_vm14 = vcmask 130048  }
  0x7f   :  { %927 = vmatprep.subr.msk.bf16.mxu1 %vm926_vm2, %v987_v11  ;;  %vm529_vm4 = vmand %vm511_vm12, %vm521_vm13 }
  0x80   :  { %vm533_vm6 = vmand %vm515_vm15, %vm525_vm1 }
  0x81   :  { %vm924_vm11 = vmpackc.low %vm533_vm6, %vm529_vm4 }
  0x82   :  { %925 = vmatpush1.bf16.msk.msra.mxu0 %vm924_vm11, %v987_v11  ;;  %vm531_vm7 = vmand %vm513_vm5, %vm523_vm0 }
  0x83   :  { %vm535_vm8 = vmand %vm517_vm3, %vm527_vm10 }
  0x84   :  { %vm928_vm9 = vmpackc.low %vm535_vm8, %vm531_vm7 }
  0x85   :  { %929 = vmatpush1.bf16.msk.msra.mxu1 %vm928_vm9, %v987_v11 }
 0x14c   :  { %v820_v9 = vpop.f32.mrb[0].mxu0 }
 0x14d   :  { %v821_v24 = vpop.f32.mrb[1].mxu0 }
 0x14e   :  { %v822_v2 = vadd.f32 %v821_v24, %v820_v9 }
 0x14f   :  { %v855_v25 = vpop.f32.mrb[0].mxu1 }
 0x150   :  { %v856_v26 = vpop.f32.mrb[1].mxu1 }
 0x151   :  { %v857_v27 = vadd.f32 %v856_v26, %v855_v25 }
 0x153   :  { %v491_v28 = vadd.f32 %v857_v27, %v822_v2 }
 0x155   :  { %934 = vrsqrt.f32 %v491_v28  ;;  %vm497_vm12 = vcmp.eq.f32.partialorder %v491_v28, inf  ;;  %v500_v31 = vand.u32 2147483648, %v491_v28  ;;  %vm499_vm13 = vcmp.eq.f32.partialorder %v491_v28, 0.0 }
 0x156   :  { %v494_v34 = vadd.f32 1.0, %v491_v28 }
 0x15f   :  { %v935_v29 = vpop.eup %934 }
 0x160   :  { %v496_v30 = vmul.f32 %v935_v29, %v491_v28 }
 0x162   :  { %v498_v32 = vsel %vm497_vm12, %v491_v28, %v496_v30 }
 0x163   :  { %v501_v33 = vsel %vm499_vm13, %v500_v31, %v498_v32 }
 0x164   :  { %v502_v35 = vadd.f32 1e-05, %v501_v33 }
 0x166   :  { %v503_v36 = vmul.f32 %v502_v35, %v494_v34 }
 0x168   :  { %936 = vrcp.f32 %v503_v36 }
 0x172   :  { %v937_v11 = vpop.eup %936 }
 0x173   :  { %v505_v39 = vmul.f32 %v937_v11, %v491_v28 }
 0x175   :  { %782 = vmatmul.mubr.msk.f32.vlgmr.msra.gmra.mrb[2].mxu0 %vm545_vm14, %v505_v39  ;;  %787 = vmatmul.mubr.msk.f32.vlgmr.msra.gmra.mrb[2].mxu1 %vm545_vm14, %v505_v39 }
 0x248   :  { %v615_v40 = vpop.f32.mrb[2].mxu0  ;;  %v686_v41 = vpop.f32.mrb[2].mxu1 }
 0x249   :  { %v691_v42 = vmul.f32 %v615_v40, %v1252_v15  ;;  %v693_v43 = vmul.f32 %v686_v41, %v1261_v17  ;;  %v617_v44 = vpop.f32.mrb[3].mxu0  ;;  %v688_v45 = vpop.f32.mrb[3].mxu1 }
 0x24a   :  { %v692_v46 = vmul.f32 %v617_v44, %v1130_v37  ;;  %v694_v47 = vmul.f32 %v688_v45, %v1132_v38 }
 0x24b   :  { %695 = vst [vmem:[#allocation5] sm:$0xff] %v691_v42  ;;  %697 = vst [vmem:[#allocation5 + $0x10] sm:$0xff] %v693_v43 }
 0x24c   :  { %696 = vst [vmem:[#allocation5 + $0x8] sm:$0xff] %v692_v46  ;;  %698 = vst [vmem:[#allocation5 + $0x18] sm:$0xff] %v694_v47 }
 0x24d   :  { %971 = shalt.err (!%p968_p12)
}
 0x24e   :  { %s972_s22 = scalar_lea.hbm %s1297_s1, 512 }
 0x24f   :  { %p973_p13 = scmp.ne.s32.totalorder %s1297_s1, %s972_s22  ;;  %p976_p0 = scmp.lt.u32.totalorder %s972_s22, %s1297_s1 }
 0x251   :  { %p978_p1 = pnand %p976_p0, %p973_p13 }
 0x253   :  { %981 = shalt.err (!%p978_p1)
}
 0x254   :  { %708 = dma.vmem_to_hbm [thread:$0]  %s706_s18, 512, %s1297_s1, [#allocation4]  }
 0x255   :  { %984 = dma.done.wait [#allocation4], 512  }
 0x256   :  { %985 = vsyncadd [#allocation4], 4294966784 }
 0x257   :  { %712 = vsyncpa [#allocation3], 1 }
 0x258   :  { %713 = vsyncpa [#allocation4], 1 }

</bundles_post_ra>
